<compile_context>
chip_gen: v7x
topology: tpu7x:2x2x1
jax: 0.10.0
libtpu: 0.0.40
codegen_flags: <defaults>
</compile_context>

<pallas_src>
import functools

import jax
import jax.numpy as jnp
from jax.experimental import pallas as pl
from jax.experimental.pallas import tpu as pltpu


def _round_up(n, m):
    return ((n + m - 1) // m) * m


def _mlp_kernel(x_ref, w1_ref, b1_ref, w2_ref, o_ref, *, activation, compute_dtype):
    # In-kernel cast of x to the MXU operand dtype (no wrapper-side cast pass).
    x = x_ref[...].astype(compute_dtype)
    # fc1: (Bt, K) @ (K, H) on the MXU with f32 accumulation.
    h = jnp.dot(x, w1_ref[...], preferred_element_type=jnp.float32)
    # Bias add + activation in f32 on the VPU/EUP (v5e has no bf16 VPU/EUP).
    h = h + b1_ref[...]

    if activation == "tanh":
        a = jnp.tanh(h)
    elif activation == "relu2":
        r = jnp.maximum(h, 0.0)
        a = r * r
    else:
        raise ValueError(f"unknown activation: {activation}")

    # fc2 (no bias): downcast activation to the weight dtype, f32 accumulation.
    o_ref[...] = jnp.dot(
        a.astype(w2_ref.dtype), w2_ref[...], preferred_element_type=jnp.float32
    ).astype(o_ref.dtype)


def prepare_params(w1, b1, w2, compute_dtype=jnp.bfloat16):
    """One-time weight preparation (hoisted out of the per-call path).

    Casts the matmul operands to `compute_dtype` (bf16 recommended on v6e/v7x;
    pass jnp.float32 for a tighter numerical path). Bias stays f32 because the
    bias/activation math is always f32 in the kernel. No padding is required.
    """
    return (
        jnp.asarray(w1, compute_dtype),
        jnp.asarray(b1, jnp.float32),
        jnp.asarray(w2, compute_dtype),
    )


def _pick_batch_tile(B, batch_tile):
    batch_tile = max(16, _round_up(batch_tile, 16))
    if B <= batch_tile:
        if B >= 64:
            # Split into >=2 grid steps so the "parallel" batch axis can shard
            # across v7x's two TensorCores (harmless on v5e/v6e).
            return _round_up((B + 1) // 2, 16)
        return B  # single grid step, block == full batch dim, no padding
    return batch_tile


def a_neural_net_forward(
    x, w1, b1, w2, *, activation, batch_tile=512,
    out_dtype=jnp.float32, xla_fallback_batch=0,
):
    """x: (B, K) f32, w1: (K, H), b1: (1, H) f32, w2: (H, O) -> (B, O) out_dtype.

    The dtype of w1/w2 (from `prepare_params`) selects the MXU operand dtype;
    accumulation is always f32 and bias/activation math stays f32.
    """
    B, K = x.shape
    H = w1.shape[1]
    O = w2.shape[1]
    compute_dtype = w1.dtype

    if B < xla_fallback_batch:
        # Tiny problems: one fused XLA op beats pallas_call + aux pad/slice kernels.
        h = jnp.dot(x.astype(compute_dtype), w1, preferred_element_type=jnp.float32)
        h = h + b1
        a = jnp.tanh(h) if activation == "tanh" else jnp.maximum(h, 0.0) ** 2
        return jnp.dot(
            a.astype(compute_dtype), w2, preferred_element_type=jnp.float32
        ).astype(out_dtype)

    Bt = _pick_batch_tile(B, batch_tile)
    Bp = _round_up(B, Bt)
    # Pad only the batch axis, and only when actually needed.
    xp = x if Bp == B else jnp.pad(x, ((0, Bp - B), (0, 0)))

    kernel = functools.partial(
        _mlp_kernel, activation=activation, compute_dtype=compute_dtype
    )
    out = pl.pallas_call(
        kernel,
        out_shape=jax.ShapeDtypeStruct((Bp, O), out_dtype),
        grid_spec=pltpu.PrefetchScalarGridSpec(
            num_scalar_prefetch=0,
            grid=(Bp // Bt,),
            in_specs=[
                # x: one batch tile per grid step.
                pl.BlockSpec((Bt, K), lambda i: (i, 0)),
                # Weights/bias: constant block index -> fetched once, VMEM-resident.
                pl.BlockSpec((K, H), lambda i: (0, 0)),
                pl.BlockSpec((1, H), lambda i: (0, 0)),
                pl.BlockSpec((H, O), lambda i: (0, 0)),
            ],
            # Unpadded output block: O == full last dim, so no padded f32 store
            # stream and no trailing lane-slice pass over the output.
            out_specs=pl.BlockSpec((Bt, O), lambda i: (i, 0)),
        ),
        compiler_params=pltpu.CompilerParams(
            # Independent batch tiles -> shard across v7x's 2 TCs; free on v5e/v6e.
            dimension_semantics=("parallel",),
            vmem_limit_bytes=32 * 1024 * 1024,
        ),
    )(xp, w1, b1, w2)

    return out if Bp == B else out[:B]


def _reference(x, w1, b1, w2, activation):
    h = x @ w1 + b1
    a = jnp.tanh(h) if activation == "tanh" else jnp.maximum(h, 0.0) ** 2
    return a @ w2


if __name__ == "__main__":
    # Shapes consistent with the module: Linear(in->hid), Linear(hid->out, no bias).
    batch, input_size, hidden_size, output_size = 8, 32, 64, 16

    key = jax.random.PRNGKey(0)
    kx, k1, kb, k2 = jax.random.split(key, 4)
    x = jax.random.normal(kx, (batch, input_size), dtype=jnp.float32)
    # PyTorch fc1.weight is (hidden, in); we store the transpose (in, hidden).
    w1 = jax.random.normal(k1, (input_size, hidden_size), dtype=jnp.float32) * 0.1
    b1 = jax.random.normal(kb, (1, hidden_size), dtype=jnp.float32) * 0.1
    # PyTorch fc2.weight is (out, hidden); we store the transpose (hidden, out).
    w2 = jax.random.normal(k2, (hidden_size, output_size), dtype=jnp.float32) * 0.1

    fwd = jax.jit(
        a_neural_net_forward,
        static_argnames=("activation", "batch_tile", "out_dtype", "xla_fallback_batch"),
    )

    # One-time weight prep (hoisted out of the per-call path).
    params_bf16 = prepare_params(w1, b1, w2, compute_dtype=jnp.bfloat16)
    params_f32 = prepare_params(w1, b1, w2, compute_dtype=jnp.float32)

    ok = True

    for activation in ("tanh", "relu2"):
        ref = _reference(x, w1, b1, w2, activation)

        # f32 matmul operands: tight tolerance.
        out_f32 = jax.block_until_ready(fwd(x, *params_f32, activation=activation))
        if not jnp.allclose(out_f32, ref, atol=1e-5, rtol=1e-5):
            ok = False

        # bf16 matmul operands (f32 accumulation): relaxed tolerance.
        out_bf16 = jax.block_until_ready(fwd(x, *params_bf16, activation=activation))
        if not jnp.allclose(out_bf16, ref, atol=3e-2, rtol=3e-2):
            ok = False

    # Multi-step batch grid: weights resident across steps, >=2 steps for the
    # v7x two-TensorCore split, no padding (256 % 128 == 0).
    big_batch = 256
    xb = jax.random.normal(jax.random.PRNGKey(1), (big_batch, input_size), jnp.float32)
    out_big = jax.block_until_ready(fwd(xb, *params_bf16, activation="tanh"))
    if not jnp.allclose(out_big, _reference(xb, w1, b1, w2, "tanh"),
                        atol=3e-2, rtol=3e-2):
        ok = False

    # Non-divisible batch -> exercises the (only-when-needed) batch padding path.
    xo = jax.random.normal(jax.random.PRNGKey(2), (100, input_size), jnp.float32)
    out_odd = jax.block_until_ready(fwd(xo, *params_f32, activation="relu2"))
    if not jnp.allclose(out_odd, _reference(xo, w1, b1, w2, "relu2"),
                        atol=1e-5, rtol=1e-5):
        ok = False

    # PyTorch-faithful init (all-zero weights) -> output must be exactly zero
    # (tanh(0)=0 and relu2(0)=0).
    zero_params = prepare_params(
        jnp.zeros_like(w1), jnp.zeros_like(b1), jnp.zeros_like(w2),
        compute_dtype=jnp.float32,
    )
    out_zero = jax.block_until_ready(fwd(x, *zero_params, activation="tanh"))
    if not jnp.allclose(out_zero, jnp.zeros((batch, output_size)), atol=0.0):
        ok = False

    if ok:
        print("KERNEL_OK")
</pallas_src>

<mosaic_0001>
module attributes {stable_mosaic.version = 11 : i64} {
  func.func @_mlp_kernel(%arg0: i32, %arg1: memref<8x32xf32, #tpu.memory_space<vmem>>, %arg2: memref<32x64xf32, #tpu.memory_space<vmem>>, %arg3: memref<1x64xf32, #tpu.memory_space<vmem>>, %arg4: memref<64x16xf32, #tpu.memory_space<vmem>>, %arg5: memref<8x16xf32, #tpu.memory_space<vmem>>) attributes {dimension_semantics = [#tpu.dimension_semantics<parallel>], iteration_bounds = array<i64: 1>, scalar_prefetch = 0 : i64, scratch_operands = 0 : i64, tpu.core_type = #tpu.core_type<tc>, window_params = [{transform_indices = @transform_0, window_bounds = array<i64: 8, 32>}, {pipeline_mode = #tpu.pipeline_mode<synchronous>, transform_indices = @transform_1, window_bounds = array<i64: 32, 64>}, {pipeline_mode = #tpu.pipeline_mode<synchronous>, transform_indices = @transform_2, window_bounds = array<i64: 1, 64>}, {pipeline_mode = #tpu.pipeline_mode<synchronous>, transform_indices = @transform_3, window_bounds = array<i64: 64, 16>}, {transform_indices = @transform_4, window_bounds = array<i64: 8, 16>}]} {
    %c0 = arith.constant 0 : index
    %c0_0 = arith.constant 0 : index
    %0 = vector.load %arg1[%c0, %c0_0] : memref<8x32xf32, #tpu.memory_space<vmem>>, vector<8x32xf32>
    %c0_1 = arith.constant 0 : index
    %c0_2 = arith.constant 0 : index
    %1 = vector.load %arg2[%c0_1, %c0_2] : memref<32x64xf32, #tpu.memory_space<vmem>>, vector<32x64xf32>
    %cst = arith.constant dense<0.000000e+00> : vector<8x64xf32>
    %2 = tpu.matmul %0, %1, %cst {dimension_numbers = #tpu.dot_dimension_numbers<[1], [0], [0], [1], [0, 0, 1, 1], [], []>} : vector<8x32xf32>, vector<32x64xf32>, vector<8x64xf32> -> vector<8x64xf32>
    %c0_3 = arith.constant 0 : index
    %c0_4 = arith.constant 0 : index
    %3 = vector.load %arg3[%c0_3, %c0_4] : memref<1x64xf32, #tpu.memory_space<vmem>>, vector<1x64xf32>
    %4 = vector.broadcast %3 : vector<1x64xf32> to vector<8x64xf32>
    %5 = arith.addf %2, %4 : vector<8x64xf32>
    %6 = math.tanh %5 : vector<8x64xf32>
    %c0_5 = arith.constant 0 : index
    %c0_6 = arith.constant 0 : index
    %7 = vector.load %arg4[%c0_5, %c0_6] : memref<64x16xf32, #tpu.memory_space<vmem>>, vector<64x16xf32>
    %cst_7 = arith.constant dense<0.000000e+00> : vector<8x16xf32>
    %8 = tpu.matmul %6, %7, %cst_7 {dimension_numbers = #tpu.dot_dimension_numbers<[1], [0], [0], [1], [0, 0, 1, 1], [], []>} : vector<8x64xf32>, vector<64x16xf32>, vector<8x16xf32> -> vector<8x16xf32>
    %c0_8 = arith.constant 0 : index
    %c0_9 = arith.constant 0 : index
    %9 = vector.load %arg5[%c0_8, %c0_9] : memref<8x16xf32, #tpu.memory_space<vmem>>, vector<8x16xf32>
    tpu.vector_store %arg5[%c0_8, %c0_9], %8 {strides = array<i32>} : memref<8x16xf32, #tpu.memory_space<vmem>>, vector<8x16xf32>,
    return
  }
  func.func @transform_0(%arg0: i32) -> (i32, i32) {
    %c0_i32 = arith.constant 0 : i32
    %c0_i32_0 = arith.constant 0 : i32
    return %arg0, %c0_i32 : i32, i32
  }
  func.func @transform_1(%arg0: i32) -> (i32, i32) {
    %c0_i32 = arith.constant 0 : i32
    %c0_i32_0 = arith.constant 0 : i32
    %c0_i32_1 = arith.constant 0 : i32
    return %c0_i32, %c0_i32_0 : i32, i32
  }
  func.func @transform_2(%arg0: i32) -> (i32, i32) {
    %c0_i32 = arith.constant 0 : i32
    %c0_i32_0 = arith.constant 0 : i32
    %c0_i32_1 = arith.constant 0 : i32
    return %c0_i32, %c0_i32_0 : i32, i32
  }
  func.func @transform_3(%arg0: i32) -> (i32, i32) {
    %c0_i32 = arith.constant 0 : i32
    %c0_i32_0 = arith.constant 0 : i32
    %c0_i32_1 = arith.constant 0 : i32
    return %c0_i32, %c0_i32_0 : i32, i32
  }
  func.func @transform_4(%arg0: i32) -> (i32, i32) {
    %c0_i32 = arith.constant 0 : i32
    %c0_i32_0 = arith.constant 0 : i32
    return %arg0, %c0_i32 : i32, i32
  }
}

</mosaic_0001>

<bundles_post_ra>
// kernel: a_neural_net_forward.1
= control target key start
LH: loop header
LB: loop body
LE: loop exit
PB: predicated region body
PF: predicated region fallthrough
CT: control target
= control target key end

     0   :  { %v298_v3 = vmov 0.0|0.0   ;;  %vm299_vm0 = vmmov 0   ;;  %v300_v6 = vmov 0.0   ;;  %s381_s0 = inlined_call_operand.vmem [shape: f32[8,32], index: 0, kind: input, shape index: {}]   ;;  %s382_s1 = inlined_call_operand.vmem [shape: f32[32,64], index: 1, kind: input, shape index: {}]   ;;  %s383_s2 = inlined_call_operand.vmem [shape: f32[1,64], index: 2, kind: input, shape index: {}]   ;;  %s384_s3 = inlined_call_operand.vmem [shape: f32[64,16], index: 3, kind: input, shape index: {}]   ;;  %s385_s4 = inlined_call_operand.hbm [shape: f32[8,16], index: 4, kind: output, shape index: {}]  }
   0x1   :  { %v19_v0 = vld [vmem:[%s382_s1] sm:$0xff]  ;;  %v20_v1 = vld [vmem:[%s382_s1 + $0x8] sm:$0xff]  ;;  %v21_v2 = vld [vmem:[%s382_s1 + $0x10] sm:$0xff]  ;;  %250 = vmatprep.subr.bf16.mxu0 %v298_v3  ;;  %228 = vmatprep.mubr.msk.f32.mxu0 %vm299_vm0, %v300_v6 }
   0x2   :  { %v251_v4 = vpack.c.bf16 %v20_v1, %v19_v0  ;;  %v22_v5 = vld [vmem:[%s382_s1 + $0x18] sm:$0xff]  ;;  %v105_v7 = vld [vmem:[%s384_s3] sm:$0xff]  ;;  %256 = vmatprep.subr.bf16.mxu1 %v298_v3  ;;  %v106_v8 = vld [vmem:[%s384_s3 + $0x8] sm:$0xff]  ;;  %247 = vmatprep.mubr.msk.f32.mxu1 %vm299_vm0, %v300_v6 }
   0x3   :  { %9 = vsyncpa [#allocation3], 0  ;;  %v254_v9 = vpack.c.bf16 %v22_v5, %v21_v2  ;;  %v257_v10 = vpack.c.bf16 %v106_v8, %v105_v7  ;;  %v18_v11 = vld [vmem:[%s381_s0] sm:$0xff]  ;;  %vm30_vm1 = vcmask 261120   ;;  %v107_v12 = vld [vmem:[%s384_s3 + $0x10] sm:$0xff]  ;;  %vm113_vm2 = vcmask 523264  }
   0x4   :  { %252 = vmatpush3.bf16.msra.mxu0 %v251_v4  ;;  %v108_v13 = vld [vmem:[%s384_s3 + $0x18] sm:$0xff]  ;;  %v109_v15 = vld [vmem:[%s384_s3 + $0x20] sm:$0xff]  ;;  %v110_v16 = vld [vmem:[%s384_s3 + $0x28] sm:$0xff]  ;;  %s301_s15 = smov [#allocation2]   ;;  %vm187_vm3 = vcmask 130048  }
   0x5   :  { %253 = vmatprep.subr.bf16.mxu0 %v298_v3  ;;  %258 = vmatpush3.bf16.msra.mxu1 %v257_v10  ;;  %v260_v14 = vpack.c.bf16 %v108_v13, %v107_v12  ;;  %v263_v17 = vpack.c.bf16 %v110_v16, %v109_v15  ;;  %v111_v18 = vld [vmem:[%s384_s3 + $0x30] sm:$0xff]  ;;  %v112_v19 = vld [vmem:[%s384_s3 + $0x38] sm:$0xff]  ;;  %v203_v21 = vld [vmem:[%s383_s2] ss:$0 sm:$0xff]  ;;  %s195_s16 = sshll.u32 %s301_s15, 4  ;;  %s196_s16 = int_to_ptr.vmem [resolvable:$true] %s195_s16 }
   0x6   :  { %259 = vmatprep.subr.bf16.mxu1 %v298_v3  ;;  %v266_v20 = vpack.c.bf16 %v112_v19, %v111_v18  ;;  %s274_s3 = scalar_lea.vmem %s196_s16, 128  ;;  %p279_p1 = scmp.lt.s32.totalorder %s196_s16, %s196_s16 }
   0x7   :  { %p275_p0 = scmp.ne.s32.totalorder %s196_s16, %s274_s3  ;;  %p280_p2 = scmp.lt.s32.totalorder %s274_s3, %s274_s3 }
   0x8   :  { %255 = vmatpush3.bf16.msra.mxu0 %v254_v9 }
   0x9   :  { %261 = vmatpush3.bf16.msra.mxu1 %v260_v14  ;;  %p281_p3 = por %p280_p2, %p279_p1 }
   0xa   :  { %262 = vmatprep.subr.bf16.mxu1 %v298_v3 }
   0xb   :  { %229 = vmatmul.mubr.msk.f32.vlgmr.msra.gmra.mrb[0].mxu0 %vm30_vm1, %v18_v11  ;;  %p282_p4 = pnand %p281_p3, %p275_p0 }
   0xd   :  { %264 = vmatpush3.bf16.msra.mxu1 %v263_v17 }
   0xe   :  { %265 = vmatprep.subr.bf16.mxu1 %v298_v3 }
  0x11   :  { %267 = vmatpush3.bf16.msra.mxu1 %v266_v20 }
  0xde   :  { %v100_v22 = vpop.f32.mrb[0].mxu0 }
  0xdf   :  { %v101_v23 = vadd.f32 %v203_v21, %v100_v22  ;;  %v230_v24 = vpop.f32.mrb[1].mxu0 }
  0xe1   :  { %272 = vtanh.f32 %v101_v23 }
  0xeb   :  { %v273_v25 = vpop.eup %272 }
  0xec   :  { %248 = vmatmul.mubr.msk.f32.vlgmr.msra.gmra.mrb[0].mxu1 %vm113_vm2, %v273_v25 }
 0x1bf   :  { %v183_v26 = vpop.f32.mrb[0].mxu1 }
 0x1c0   :  { %188 = vst.msk [vmem:[#allocation2] sm:$0xff] %vm187_vm3, %v183_v26  ;;  %v249_v27 = vpop.f32.mrb[1].mxu1 }
 0x1c1   :  { %285 = shalt.err (!%p282_p4)
}
 0x1c2   :  { %s286_s18 = scalar_lea.hbm %s385_s4, 128 }
 0x1c3   :  { %p287_p5 = scmp.ne.s32.totalorder %s385_s4, %s286_s18  ;;  %p290_p6 = scmp.lt.u32.totalorder %s286_s18, %s385_s4 }
 0x1c5   :  { %p292_p7 = pnand %p290_p6, %p287_p5 }
 0x1c7   :  { %295 = shalt.err (!%p292_p7)
}
 0x1c8   :  { %198 = dma.vmem_to_hbm [thread:$0]  %s196_s16, 128, %s385_s4, [#allocation3]  }
 0x1c9   :  { %296 = dma.done.wait [#allocation3], 128  }
 0x1ca   :  { %297 = vsyncadd [#allocation3], 4294967168 }
 0x1cb   :  { %202 = vsyncpa [#allocation3], 1 }

</bundles_post_ra>
